<compile_context>
chip_gen: v7x
topology: tpu7x:2x2x1
jax: 0.10.0
libtpu: 0.0.40
codegen_flags: <defaults>
</compile_context>

<pallas_src>
import functools

import jax
import jax.numpy as jnp
from jax.experimental import pallas as pl
from jax.experimental.pallas import tpu as pltpu

LANE = 128
SUBLANE = 8
NUM_MATMUL_LAYERS = 4   # layers 1..4 go through the MXU; layer 5 (4->1) is a lane reduce


def _round_up(n, m):
    return (n + m - 1) // m * m


def _mlp_kernel(x_ref, w_ref, b_ref, o_ref, *, d_pad, f_in):
    # x_ref : (TB, F)                       batch tile at natural feature width
    # w_ref : (NUM_MATMUL_LAYERS*d_pad, d_pad)  packed weight slab (layer l at rows l*d_pad..)
    # b_ref : (8, d_pad)                    rows 0..3: biases of layers 1..4,
    #                                       row 4: layer-5 weight row, row 5[0]: layer-5 bias
    # o_ref : (TB, 1)                       compact output block
    h = x_ref[...]                                                       # (TB, F) f32

    # Layer 1: narrow-K dot (K = f_in); output is 128-lane from here on.
    h = jnp.dot(h, w_ref[0:f_in, :],
                preferred_element_type=jnp.float32) + b_ref[0, :]
    h = jnp.tanh(h)
    # Dropout = identity (eval)

    # Layers 2..4: full-width dots against VMEM-resident slab slices.
    for layer in range(1, NUM_MATMUL_LAYERS):
        w = w_ref[layer * d_pad:(layer + 1) * d_pad, :]                  # static slice
        h = jnp.dot(h, w, preferred_element_type=jnp.float32) + b_ref[layer, :]
        h = jnp.tanh(h)
        # Dropout = identity (eval)

    # Layer 5 (4 -> 1): single output column, so use VPU multiply + XLU lane
    # reduction instead of a padded MXU matmul.
    w5 = b_ref[NUM_MATMUL_LAYERS, :]                                     # (d_pad,)
    b5 = b_ref[NUM_MATMUL_LAYERS + 1, :1]                                # (1,)
    o_ref[...] = jnp.sum(h * w5, axis=-1, keepdims=True) + b5            # (TB, 1)


def pack_params(params, in_features):
    """Pack the 5 (W[in,out], b[out]) pairs into two (8,128)-aligned f32 slabs.

    Run ONCE at init; the packed slabs are what the forward path consumes.
    Layers 1..4 are stored as zero-padded (d_pad, d_pad) blocks; layer 5's weight
    is stored as a single row of the bias slab and its bias as a scalar.
    Zero rows / zero bias columns keep the math exact (tanh(0)=0 columns are
    killed by the zero rows of the next layer).
    """
    dims = [in_features] + [w.shape[1] for w, _ in params]
    d_pad = _round_up(max(dims), LANE)

    w_slab = jnp.zeros((NUM_MATMUL_LAYERS * d_pad, d_pad), jnp.float32)
    b_slab = jnp.zeros((SUBLANE, d_pad), jnp.float32)
    for i in range(NUM_MATMUL_LAYERS):                       # layers 1..4
        w, b = params[i]
        fi, fo = w.shape
        w_slab = w_slab.at[i * d_pad:i * d_pad + fi, :fo].set(w.astype(jnp.float32))
        b_slab = b_slab.at[i, :fo].set(b.astype(jnp.float32))
    w5, b5 = params[NUM_MATMUL_LAYERS]                       # (4, 1), (1,)
    b_slab = b_slab.at[NUM_MATMUL_LAYERS, :w5.shape[0]].set(w5[:, 0].astype(jnp.float32))
    b_slab = b_slab.at[NUM_MATMUL_LAYERS + 1, 0].set(b5[0].astype(jnp.float32))
    return w_slab, b_slab, d_pad


def mlp_forward(x, w_slab, b_slab, d_pad, *, tile_b=1024):
    """x: (B, F) float32. w_slab/b_slab/d_pad from pack_params (computed once)."""
    B, F = x.shape

    # Batch tile: multiple of 8, amortizes per-grid-step pipeline overhead.
    TB = min(_round_up(tile_b, SUBLANE), _round_up(B, SUBLANE))
    B_pad = _round_up(B, TB)
    if B_pad != B:
        x = jnp.pad(x.astype(jnp.float32), ((0, B_pad - B), (0, 0)))
    else:
        x = x.astype(jnp.float32)

    grid = (B_pad // TB,)
    kernel = functools.partial(_mlp_kernel, d_pad=d_pad, f_in=F)

    out_p = pl.pallas_call(
        kernel,
        out_shape=jax.ShapeDtypeStruct((B_pad, 1), jnp.float32),
        grid=grid,
        in_specs=[
            pl.BlockSpec((TB, F), lambda i: (i, 0)),          # x tile streams (natural width)
            pl.BlockSpec(w_slab.shape, lambda i: (0, 0)),     # weight slab, VMEM-resident
            pl.BlockSpec(b_slab.shape, lambda i: (0, 0)),     # bias slab, VMEM-resident
        ],
        out_specs=pl.BlockSpec((TB, 1), lambda i: (i, 0)),    # compact (TB, 1) output
        compiler_params=pltpu.CompilerParams(
            dimension_semantics=("parallel",)),
    )(x, w_slab, b_slab)

    return out_p[:B] if B_pad != B else out_p


def init_params(key, in_features):
    """Deterministic init mimicking nn.Linear shapes (weights stored transposed: (in, out))."""
    dims = [(in_features, in_features * 2),
            (in_features * 2, 32),
            (32, 16),
            (16, 4),
            (4, 1)]
    params = []
    for i, (fi, fo) in enumerate(dims):
        kw, kb = jax.random.split(jax.random.fold_in(key, i))
        bound = 1.0 / jnp.sqrt(jnp.float32(fi))
        w = jax.random.uniform(kw, (fi, fo), jnp.float32, -bound, bound)
        b = jax.random.uniform(kb, (fo,), jnp.float32, -bound, bound)
        params.append((w, b))
    return params


def reference_forward(x, params):
    h = x
    for i, (w, b) in enumerate(params):
        h = h @ w + b
        if i < len(params) - 1:
            h = jnp.tanh(h)
    return h


if __name__ == "__main__":
    key = jax.random.PRNGKey(0)
    B, F = 8, 16                      # batch=8, train_x.shape[1]=16
    kx, kp = jax.random.split(key)
    x = jax.random.normal(kx, (B, F), jnp.float32)
    params = init_params(kp, F)

    # Pack parameters ONCE (hoisted out of the forward path).
    w_slab, b_slab, d_pad = pack_params(params, F)

    out = mlp_forward(x, w_slab, b_slab, d_pad)
    out = jax.block_until_ready(out)

    ref = reference_forward(x, params)
    assert out.shape == (B, 1), out.shape
    assert jnp.allclose(out, ref, atol=1e-5, rtol=1e-5), (out, ref)
    print("KERNEL_OK")
</pallas_src>

<mosaic_0001>
module attributes {stable_mosaic.version = 11 : i64} {
  func.func @_mlp_kernel(%arg0: i32, %arg1: memref<8x16xf32, #tpu.memory_space<vmem>>, %arg2: memref<512x128xf32, #tpu.memory_space<vmem>>, %arg3: memref<8x128xf32, #tpu.memory_space<vmem>>, %arg4: memref<8x1xf32, #tpu.memory_space<vmem>>) attributes {dimension_semantics = [#tpu.dimension_semantics<parallel>], iteration_bounds = array<i64: 1>, scalar_prefetch = 0 : i64, scratch_operands = 0 : i64, tpu.core_type = #tpu.core_type<tc>, window_params = [{transform_indices = @transform_0, window_bounds = array<i64: 8, 16>}, {pipeline_mode = #tpu.pipeline_mode<synchronous>, transform_indices = @transform_1, window_bounds = array<i64: 512, 128>}, {pipeline_mode = #tpu.pipeline_mode<synchronous>, transform_indices = @transform_2, window_bounds = array<i64: 8, 128>}, {transform_indices = @transform_3, window_bounds = array<i64: 8, 1>}]} {
    %c0 = arith.constant 0 : index
    %c0_0 = arith.constant 0 : index
    %0 = vector.load %arg1[%c0, %c0_0] : memref<8x16xf32, #tpu.memory_space<vmem>>, vector<8x16xf32>
    %c0_1 = arith.constant 0 : index
    %c0_2 = arith.constant 0 : index
    %1 = vector.load %arg2[%c0_1, %c0_2] : memref<512x128xf32, #tpu.memory_space<vmem>>, vector<16x128xf32>
    %cst = arith.constant dense<0.000000e+00> : vector<8x128xf32>
    %2 = tpu.matmul %0, %1, %cst {dimension_numbers = #tpu.dot_dimension_numbers<[1], [0], [0], [1], [0, 0, 1, 1], [], []>} : vector<8x16xf32>, vector<16x128xf32>, vector<8x128xf32> -> vector<8x128xf32>
    %c0_3 = arith.constant 0 : index
    %c0_4 = arith.constant 0 : index
    %3 = vector.load %arg3[%c0_3, %c0_4] : memref<8x128xf32, #tpu.memory_space<vmem>>, vector<1x128xf32>
    %4 = vector.shape_cast %3 : vector<1x128xf32> to vector<128xf32>
    %5 = vector.shape_cast %4 : vector<128xf32> to vector<1x128xf32>
    %6 = vector.broadcast %5 : vector<1x128xf32> to vector<8x128xf32>
    %7 = arith.addf %2, %6 : vector<8x128xf32>
    %8 = math.tanh %7 : vector<8x128xf32>
    %c128 = arith.constant 128 : index
    %c0_5 = arith.constant 0 : index
    %9 = vector.load %arg2[%c128, %c0_5] : memref<512x128xf32, #tpu.memory_space<vmem>>, vector<128x128xf32>
    %cst_6 = arith.constant dense<0.000000e+00> : vector<8x128xf32>
    %10 = tpu.matmul %8, %9, %cst_6 {dimension_numbers = #tpu.dot_dimension_numbers<[1], [0], [0], [1], [0, 0, 1, 1], [], []>} : vector<8x128xf32>, vector<128x128xf32>, vector<8x128xf32> -> vector<8x128xf32>
    %c1 = arith.constant 1 : index
    %c0_7 = arith.constant 0 : index
    %11 = vector.load %arg3[%c1, %c0_7] : memref<8x128xf32, #tpu.memory_space<vmem>>, vector<1x128xf32>
    %12 = vector.shape_cast %11 : vector<1x128xf32> to vector<128xf32>
    %13 = vector.shape_cast %12 : vector<128xf32> to vector<1x128xf32>
    %14 = vector.broadcast %13 : vector<1x128xf32> to vector<8x128xf32>
    %15 = arith.addf %10, %14 : vector<8x128xf32>
    %16 = math.tanh %15 : vector<8x128xf32>
    %c256 = arith.constant 256 : index
    %c0_8 = arith.constant 0 : index
    %17 = vector.load %arg2[%c256, %c0_8] : memref<512x128xf32, #tpu.memory_space<vmem>>, vector<128x128xf32>
    %cst_9 = arith.constant dense<0.000000e+00> : vector<8x128xf32>
    %18 = tpu.matmul %16, %17, %cst_9 {dimension_numbers = #tpu.dot_dimension_numbers<[1], [0], [0], [1], [0, 0, 1, 1], [], []>} : vector<8x128xf32>, vector<128x128xf32>, vector<8x128xf32> -> vector<8x128xf32>
    %c2 = arith.constant 2 : index
    %c0_10 = arith.constant 0 : index
    %19 = vector.load %arg3[%c2, %c0_10] : memref<8x128xf32, #tpu.memory_space<vmem>>, vector<1x128xf32>
    %20 = vector.shape_cast %19 : vector<1x128xf32> to vector<128xf32>
    %21 = vector.shape_cast %20 : vector<128xf32> to vector<1x128xf32>
    %22 = vector.broadcast %21 : vector<1x128xf32> to vector<8x128xf32>
    %23 = arith.addf %18, %22 : vector<8x128xf32>
    %24 = math.tanh %23 : vector<8x128xf32>
    %c384 = arith.constant 384 : index
    %c0_11 = arith.constant 0 : index
    %25 = vector.load %arg2[%c384, %c0_11] : memref<512x128xf32, #tpu.memory_space<vmem>>, vector<128x128xf32>
    %cst_12 = arith.constant dense<0.000000e+00> : vector<8x128xf32>
    %26 = tpu.matmul %24, %25, %cst_12 {dimension_numbers = #tpu.dot_dimension_numbers<[1], [0], [0], [1], [0, 0, 1, 1], [], []>} : vector<8x128xf32>, vector<128x128xf32>, vector<8x128xf32> -> vector<8x128xf32>
    %c3 = arith.constant 3 : index
    %c0_13 = arith.constant 0 : index
    %27 = vector.load %arg3[%c3, %c0_13] : memref<8x128xf32, #tpu.memory_space<vmem>>, vector<1x128xf32>
    %28 = vector.shape_cast %27 : vector<1x128xf32> to vector<128xf32>
    %29 = vector.shape_cast %28 : vector<128xf32> to vector<1x128xf32>
    %30 = vector.broadcast %29 : vector<1x128xf32> to vector<8x128xf32>
    %31 = arith.addf %26, %30 : vector<8x128xf32>
    %32 = math.tanh %31 : vector<8x128xf32>
    %c4 = arith.constant 4 : index
    %c0_14 = arith.constant 0 : index
    %33 = vector.load %arg3[%c4, %c0_14] : memref<8x128xf32, #tpu.memory_space<vmem>>, vector<1x128xf32>
    %34 = vector.shape_cast %33 : vector<1x128xf32> to vector<128xf32>
    %c5 = arith.constant 5 : index
    %c0_15 = arith.constant 0 : index
    %35 = vector.load %arg3[%c5, %c0_15] : memref<8x128xf32, #tpu.memory_space<vmem>>, vector<1x1xf32>
    %36 = vector.shape_cast %35 : vector<1x1xf32> to vector<1xf32>
    %37 = vector.shape_cast %34 : vector<128xf32> to vector<1x128xf32>
    %38 = vector.broadcast %37 : vector<1x128xf32> to vector<8x128xf32>
    %39 = arith.mulf %32, %38 : vector<8x128xf32>
    %cst_16 = arith.constant dense<0.000000e+00> : vector<8xf32>
    %40 = vector.multi_reduction <add>, %39, %cst_16 [1] : vector<8x128xf32> to vector<8xf32>
    %41 = vector.shape_cast %40 : vector<8xf32> to vector<8x1xf32>
    %42 = vector.shape_cast %36 : vector<1xf32> to vector<1x1xf32>
    %43 = vector.broadcast %42 : vector<1x1xf32> to vector<8x1xf32>
    %44 = arith.addf %41, %43 : vector<8x1xf32>
    %c0_17 = arith.constant 0 : index
    %c0_18 = arith.constant 0 : index
    %45 = vector.load %arg4[%c0_17, %c0_18] : memref<8x1xf32, #tpu.memory_space<vmem>>, vector<8x1xf32>
    tpu.vector_store %arg4[%c0_17, %c0_18], %44 {strides = array<i32>} : memref<8x1xf32, #tpu.memory_space<vmem>>, vector<8x1xf32>,
    return
  }
  func.func @transform_0(%arg0: i32) -> (i32, i32) {
    %c0_i32 = arith.constant 0 : i32
    %c0_i32_0 = arith.constant 0 : i32
    return %arg0, %c0_i32 : i32, i32
  }
  func.func @transform_1(%arg0: i32) -> (i32, i32) {
    %c0_i32 = arith.constant 0 : i32
    %c0_i32_0 = arith.constant 0 : i32
    %c0_i32_1 = arith.constant 0 : i32
    return %c0_i32, %c0_i32_0 : i32, i32
  }
  func.func @transform_2(%arg0: i32) -> (i32, i32) {
    %c0_i32 = arith.constant 0 : i32
    %c0_i32_0 = arith.constant 0 : i32
    %c0_i32_1 = arith.constant 0 : i32
    return %c0_i32, %c0_i32_0 : i32, i32
  }
  func.func @transform_3(%arg0: i32) -> (i32, i32) {
    %c0_i32 = arith.constant 0 : i32
    %c0_i32_0 = arith.constant 0 : i32
    return %arg0, %c0_i32 : i32, i32
  }
}

</mosaic_0001>

<bundles_post_ra>
// kernel: tpu_custom_call.1
= control target key start
LH: loop header
LB: loop body
LE: loop exit
PB: predicated region body
PF: predicated region fallthrough
CT: control target
= control target key end

     0   :  { %8 = vsyncpa [#allocation3], 0  ;;  %s866_s0 = inlined_call_operand.hbm [shape: f32[8,16], index: 0, kind: input, shape index: {}]   ;;  %s867_s1 = inlined_call_operand.hbm [shape: f32[512,128], index: 1, kind: input, shape index: {}]   ;;  %s868_s2 = inlined_call_operand.hbm [shape: f32[8,128], index: 2, kind: input, shape index: {}]   ;;  %s869_s3 = inlined_call_operand.vmem [shape: f32[8,1], index: 3, kind: output, shape index: {}]  }
   0x1   :  { %9 = vsyncpa [#allocation5], 0  ;;  %s766_s12 = smov [#allocation4]   ;;  %s696_s16 = scalar_lea.hbm %s867_s1, 8192 }
   0x2   :  { %s25_s13 = sshll.u32 %s766_s12, 4  ;;  %p697_p0 = scmp.ne.s32.totalorder %s867_s1, %s696_s16  ;;  %s26_s13 = int_to_ptr.vmem [resolvable:$true] %s25_s13 }
   0x3   :  { %p700_p1 = scmp.lt.u32.totalorder %s696_s16, %s867_s1 }
   0x5   :  { %p702_p2 = pnand %p700_p1, %p697_p0 }
   0x7   :  { %705 = shalt.err (!%p702_p2)
}
   0x8   :  { %s706_s21 = scalar_lea.vmem %s26_s13, 8192  ;;  %p711_p4 = scmp.lt.s32.totalorder %s26_s13, %s26_s13 }
   0x9   :  { %p707_p3 = scmp.ne.s32.totalorder %s26_s13, %s706_s21  ;;  %p712_p5 = scmp.lt.s32.totalorder %s706_s21, %s706_s21 }
   0xb   :  { %p713_p6 = por %p712_p5, %p711_p4 }
   0xd   :  { %p714_p7 = pnand %p713_p6, %p707_p3 }
   0xf   :  { %717 = shalt.err (!%p714_p7)
}
  0x10   :  { %s767_s22 = smov 128   ;;  %s768_s23 = smov 8  }
  0x11   :  { %31 = dma.hbm_to_vmem [thread:$0]  %s867_s1, 8192, %s26_s13, [#allocation5], %s767_s22, %s767_s22, %s768_s23  }
  0x12   :  { %s769_s26 = smov [#allocation2]   ;;  %s770_s28 = smov [#allocation6]  }
  0x13   :  { %s16_s27 = sshll.u32 %s769_s26, 4  ;;  %s38_s29 = sshll.u32 %s770_s28, 4  ;;  %s17_s27 = int_to_ptr.vmem [resolvable:$true] %s16_s27  ;;  %s39_s29 = int_to_ptr.vmem [resolvable:$true] %s38_s29 }
  0x14   :  { %s718_s5 = scalar_lea.hbm %s866_s0, 128 }
  0x15   :  { %p719_p8 = scmp.ne.s32.totalorder %s866_s0, %s718_s5  ;;  %p722_p9 = scmp.lt.u32.totalorder %s718_s5, %s866_s0 }
  0x17   :  { %p724_p10 = pnand %p722_p9, %p719_p8 }
  0x19   :  { %727 = shalt.err (!%p724_p10)
}
  0x1a   :  { %s728_s1 = scalar_lea.vmem %s17_s27, 128  ;;  %p733_p12 = scmp.lt.s32.totalorder %s17_s27, %s17_s27 }
  0x1b   :  { %p729_p11 = scmp.ne.s32.totalorder %s17_s27, %s728_s1  ;;  %p734_p13 = scmp.lt.s32.totalorder %s728_s1, %s728_s1 }
  0x1d   :  { %p735_p0 = por %p734_p13, %p733_p12 }
  0x1f   :  { %p736_p1 = pnand %p735_p0, %p729_p11 }
  0x21   :  { %739 = shalt.err (!%p736_p1)
}
  0x22   :  { %19 = dma.hbm_to_vmem [thread:$0]  %s866_s0, 128, %s17_s27, [#allocation3]  }
  0x23   :  { %s740_s14 = scalar_lea.hbm %s868_s2, 128 }
  0x24   :  { %p741_p2 = scmp.ne.s32.totalorder %s868_s2, %s740_s14  ;;  %p744_p3 = scmp.lt.u32.totalorder %s740_s14, %s868_s2 }
  0x26   :  { %p746_p4 = pnand %p744_p3, %p741_p2 }
  0x28   :  { %749 = shalt.err (!%p746_p4)
}
  0x29   :  { %s750_s19 = scalar_lea.vmem %s39_s29, 128  ;;  %p755_p6 = scmp.lt.s32.totalorder %s39_s29, %s39_s29 }
  0x2a   :  { %p751_p5 = scmp.ne.s32.totalorder %s39_s29, %s750_s19  ;;  %p756_p7 = scmp.lt.s32.totalorder %s750_s19, %s750_s19 }
  0x2c   :  { %p757_p8 = por %p756_p7, %p755_p6 }
  0x2e   :  { %p758_p9 = pnand %p757_p8, %p751_p5 }
  0x30   :  { %761 = shalt.err (!%p758_p9)
}
  0x31   :  { %41 = dma.hbm_to_vmem [thread:$0]  %s868_s2, 128, %s39_s29, [#allocation5]  }
  0x32   :  { %762 = dma.done.wait [#allocation3], 128  }
  0x33   :  { %763 = vsyncadd [#allocation3], 4294967168 }
  0x34   :  { %764 = dma.done.wait [#allocation5], 8320  }
  0x35   :  { %765 = vsyncadd [#allocation5], 4294958976  ;;  %v771_v0 = vmov 0.0|0.0   ;;  %vm772_vm0 = vmmov 0   ;;  %v773_v1 = vmov 0.0   ;;  %v52_v2 = vld [vmem:[#allocation4] sm:$0xff] }
  0x36   :  { %605 = vmatprep.subr.bf16.mxu0 %v771_v0  ;;  %497 = vmatprep.mubr.msk.f32.mxu0 %vm772_vm0, %v773_v1  ;;  %v53_v3 = vld [vmem:[#allocation4 + $0x8] sm:$0xff]  ;;  %v134_v5 = vld [vmem:[#allocation4 + $0x80] sm:$0xff]  ;;  %v136_v7 = vld [vmem:[#allocation4 + $0x90] sm:$0xff]  ;;  %vm59_vm1 = vcmask 130048   ;;  %vm424_vm2 = vcmask 7168  }
  0x37   :  { %608 = vmatprep.subr.bf16.mxu1 %v771_v0  ;;  %532 = vmatprep.mubr.msk.f32.mxu1 %vm772_vm0, %v773_v1  ;;  %v606_v4 = vpack.c.bf16 %v53_v3, %v52_v2  ;;  %v135_v6 = vld [vmem:[#allocation4 + $0x88] sm:$0xff]  ;;  %v137_v9 = vld [vmem:[#allocation4 + $0x98] sm:$0xff]  ;;  %v138_v12 = vld [vmem:[#allocation4 + $0xa0] sm:$0xff] }
  0x38   :  { %v609_v8 = vpack.c.bf16 %v135_v6, %v134_v5  ;;  %v51_v10 = vld [vmem:[#allocation2] sm:$0xff]  ;;  %v612_v11 = vpack.c.bf16 %v137_v9, %v136_v7  ;;  %v139_v13 = vld [vmem:[#allocation4 + $0xa8] sm:$0xff]  ;;  %v140_v15 = vld [vmem:[#allocation4 + $0xb0] sm:$0xff] }
  0x39   :  { %607 = vmatpush3.bf16.msra.mxu0 %v606_v4  ;;  %v615_v14 = vpack.c.bf16 %v139_v13, %v138_v12  ;;  %v141_v16 = vld [vmem:[#allocation4 + $0xb8] sm:$0xff]  ;;  %v142_v18 = vld [vmem:[#allocation4 + $0xc0] sm:$0xff]  ;;  %v143_v19 = vld [vmem:[#allocation4 + $0xc8] sm:$0xff] }
  0x3a   :  { %610 = vmatpush3.bf16.msra.mxu1 %v609_v8  ;;  %632 = vmatprep.subr.bf16.mxu0 %v771_v0  ;;  %v618_v17 = vpack.c.bf16 %v141_v16, %v140_v15  ;;  %v621_v20 = vpack.c.bf16 %v143_v19, %v142_v18  ;;  %v144_v21 = vld [vmem:[#allocation4 + $0xd0] sm:$0xff]  ;;  %v145_v22 = vld [vmem:[#allocation4 + $0xd8] sm:$0xff]  ;;  %v146_v24 = vld [vmem:[#allocation4 + $0xe0] sm:$0xff] }
  0x3b   :  { %611 = vmatprep.subr.bf16.mxu1 %v771_v0  ;;  %v624_v23 = vpack.c.bf16 %v145_v22, %v144_v21  ;;  %v147_v25 = vld [vmem:[#allocation4 + $0xe8] sm:$0xff]  ;;  %v148_v27 = vld [vmem:[#allocation4 + $0xf0] sm:$0xff]  ;;  %v149_v28 = vld [vmem:[#allocation4 + $0xf8] sm:$0xff] }
  0x3c   :  { %498 = vmatmul.mubr.msk.f32.vlgmr.msra.gmra.mrb[0].mxu0 %vm59_vm1, %v51_v10  ;;  %v627_v26 = vpack.c.bf16 %v147_v25, %v146_v24  ;;  %v630_v29 = vpack.c.bf16 %v149_v28, %v148_v27  ;;  %v226_v30 = vld [vmem:[#allocation4 + $0x100] sm:$0xff]  ;;  %v227_v31 = vld [vmem:[#allocation4 + $0x108] sm:$0xff]  ;;  %v228_v32 = vld [vmem:[#allocation4 + $0x110] sm:$0xff] }
  0x3d   :  { %567 = vmatprep.mubr.msk.f32.mxu0 %vm772_vm0, %v773_v1  ;;  %v633_v33 = vpack.c.bf16 %v227_v31, %v226_v30  ;;  %v229_v34 = vld [vmem:[#allocation4 + $0x118] sm:$0xff]  ;;  %v230_v36 = vld [vmem:[#allocation4 + $0x120] sm:$0xff]  ;;  %v231_v37 = vld [vmem:[#allocation4 + $0x128] sm:$0xff] }
  0x3e   :  { %613 = vmatpush3.bf16.msra.mxu1 %v612_v11  ;;  %v636_v35 = vpack.c.bf16 %v229_v34, %v228_v32  ;;  %v639_v38 = vpack.c.bf16 %v231_v37, %v230_v36  ;;  %v232_v39 = vld [vmem:[#allocation4 + $0x130] sm:$0xff]  ;;  %v233_v40 = vld [vmem:[#allocation4 + $0x138] sm:$0xff]  ;;  %v234_v42 = vld [vmem:[#allocation4 + $0x140] sm:$0xff] }
  0x3f   :  { %614 = vmatprep.subr.bf16.mxu1 %v771_v0  ;;  %634 = vmatpush3.bf16.msra.mxu0 %v633_v33  ;;  %v642_v41 = vpack.c.bf16 %v233_v40, %v232_v39  ;;  %v235_v43 = vld [vmem:[#allocation4 + $0x148] sm:$0xff]  ;;  %v432_v45 = vld [vmem:[#allocation6] ss:$0 sm:$0xff]  ;;  %v236_v50 = vld [vmem:[#allocation4 + $0x150] sm:$0xff] }
  0x40   :  { %635 = vmatprep.subr.bf16.mxu0 %v771_v0  ;;  %v645_v44 = vpack.c.bf16 %v235_v43, %v234_v42  ;;  %v237_v51 = vld [vmem:[#allocation4 + $0x158] sm:$0xff]  ;;  %v238_v53 = vld [vmem:[#allocation4 + $0x160] sm:$0xff]  ;;  %v239_v54 = vld [vmem:[#allocation4 + $0x168] sm:$0xff] }
  0x41   :  { %v648_v52 = vpack.c.bf16 %v237_v51, %v236_v50  ;;  %v651_v55 = vpack.c.bf16 %v239_v54, %v238_v53  ;;  %v240_v56 = vld [vmem:[#allocation4 + $0x170] sm:$0xff]  ;;  %v241_v57 = vld [vmem:[#allocation4 + $0x178] sm:$0xff]  ;;  %v318_v59 = vld [vmem:[#allocation4 + $0x180] sm:$0xff] }
  0x42   :  { %616 = vmatpush3.bf16.msra.mxu1 %v615_v14  ;;  %v654_v58 = vpack.c.bf16 %v241_v57, %v240_v56  ;;  %v319_v60 = vld [vmem:[#allocation4 + $0x188] sm:$0xff]  ;;  %v320_v61 = vld [vmem:[#allocation4 + $0x190] sm:$0xff]  ;;  %v321_v63 = vld [vmem:[#allocation4 + $0x198] sm:$0xff] }
  0x43   :  { %617 = vmatprep.subr.bf16.mxu1 %v771_v0  ;;  %637 = vmatpush3.bf16.msra.mxu0 %v636_v35  ;;  %v657_v62 = vpack.c.bf16 %v319_v60, %v318_v59  ;;  %v322_v2 = vld [vmem:[#allocation4 + $0x1a0] sm:$0xff]  ;;  %v323_v3 = vld [vmem:[#allocation4 + $0x1a8] sm:$0xff]  ;;  %v324_v5 = vld [vmem:[#allocation4 + $0x1b0] sm:$0xff] }
  0x44   :  { %638 = vmatprep.subr.bf16.mxu0 %v771_v0  ;;  %v663_v4 = vpack.c.bf16 %v323_v3, %v322_v2  ;;  %v325_v6 = vld [vmem:[#allocation4 + $0x1b8] sm:$0xff]  ;;  %v326_v8 = vld [vmem:[#allocation4 + $0x1c0] sm:$0xff]  ;;  %v327_v9 = vld [vmem:[#allocation4 + $0x1c8] sm:$0xff] }
  0x45   :  { %v666_v7 = vpack.c.bf16 %v325_v6, %v324_v5  ;;  %v669_v10 = vpack.c.bf16 %v327_v9, %v326_v8  ;;  %v434_v11 = vld [vmem:[#allocation6 + $0x1] ss:$0 sm:$0xff]  ;;  %v328_v16 = vld [vmem:[#allocation4 + $0x1d0] sm:$0xff]  ;;  %v435_v25 = vld [vmem:[#allocation6 + $0x2] ss:$0 sm:$0xff] }
  0x46   :  { %619 = vmatpush3.bf16.msra.mxu1 %v618_v17  ;;  %v329_v17 = vld [vmem:[#allocation4 + $0x1d8] sm:$0xff]  ;;  %v330_v19 = vld [vmem:[#allocation4 + $0x1e0] sm:$0xff]  ;;  %v332_v22 = vld [vmem:[#allocation4 + $0x1f0] sm:$0xff] }
  0x47   :  { %620 = vmatprep.subr.bf16.mxu1 %v771_v0  ;;  %640 = vmatpush3.bf16.msra.mxu0 %v639_v38  ;;  %v672_v18 = vpack.c.bf16 %v329_v17, %v328_v16  ;;  %v436_v30 = vld [vmem:[#allocation6 + $0x3] ss:$0 sm:$0xff]  ;;  %v437_v34 = vld [vmem:[#allocation6 + $0x4] ss:$0 sm:$0xff]  ;;  %v438_v37 = vld [vmem:[#allocation6 + $0x5] ss:$0 sm:$0xff] }
  0x48   :  { %641 = vmatprep.subr.bf16.mxu0 %v771_v0 }
  0x4a   :  { %622 = vmatpush3.bf16.msra.mxu1 %v621_v20  ;;  %v331_v20 = vld [vmem:[#allocation4 + $0x1e8] sm:$0xff] }
  0x4b   :  { %623 = vmatprep.subr.bf16.mxu1 %v771_v0  ;;  %643 = vmatpush3.bf16.msra.mxu0 %v642_v41  ;;  %v675_v21 = vpack.c.bf16 %v331_v20, %v330_v19 }
  0x4c   :  { %644 = vmatprep.subr.bf16.mxu0 %v771_v0 }
  0x4e   :  { %625 = vmatpush3.bf16.msra.mxu1 %v624_v23  ;;  %v333_v23 = vld [vmem:[#allocation4 + $0x1f8] sm:$0xff] }
  0x4f   :  { %626 = vmatprep.subr.bf16.mxu1 %v771_v0  ;;  %646 = vmatpush3.bf16.msra.mxu0 %v645_v44  ;;  %v678_v24 = vpack.c.bf16 %v333_v23, %v332_v22 }
  0x50   :  { %647 = vmatprep.subr.bf16.mxu0 %v771_v0 }
  0x52   :  { %628 = vmatpush3.bf16.msra.mxu1 %v627_v26 }
  0x53   :  { %629 = vmatprep.subr.bf16.mxu1 %v771_v0  ;;  %649 = vmatpush3.bf16.msra.mxu0 %v648_v52 }
  0x54   :  { %650 = vmatprep.subr.bf16.mxu0 %v771_v0 }
  0x56   :  { %631 = vmatpush3.bf16.msra.mxu1 %v630_v29 }
  0x57   :  { %656 = vmatprep.subr.bf16.mxu1 %v771_v0  ;;  %652 = vmatpush3.bf16.msra.mxu0 %v651_v55 }
  0x58   :  { %653 = vmatprep.subr.bf16.mxu0 %v771_v0 }
  0x5b   :  { %655 = vmatpush3.bf16.msra.mxu0 %v654_v58 }
 0x10f   :  { %v129_v46 = vpop.f32.mrb[0].mxu0 }
 0x110   :  { %v130_v47 = vadd.f32 %v432_v45, %v129_v46  ;;  %v499_v48 = vpop.f32.mrb[1].mxu0 }
 0x112   :  { %688 = vtanh.f32 %v130_v47 }
 0x11c   :  { %v689_v49 = vpop.eup %688 }
 0x11d   :  { %533 = vmatmul.mubr.f32.vlgmr.msra.gmra.mrb[0].mxu1 %v689_v49 }
 0x11e   :  { %602 = vmatprep.mubr.msk.f32.mxu1 %vm772_vm0, %v773_v1  ;;  %658 = vmatpush3.bf16.msra.mxu1 %v657_v62  ;;  %v660_v1 = vpack.c.bf16 %v321_v63, %v320_v61 }
 0x11f   :  { %659 = vmatprep.subr.bf16.mxu1 %v771_v0 }
 0x122   :  { %661 = vmatpush3.bf16.msra.mxu1 %v660_v1 }
 0x123   :  { %662 = vmatprep.subr.bf16.mxu1 %v771_v0 }
 0x126   :  { %664 = vmatpush3.bf16.msra.mxu1 %v663_v4 }
 0x127   :  { %665 = vmatprep.subr.bf16.mxu1 %v771_v0 }
 0x12a   :  { %667 = vmatpush3.bf16.msra.mxu1 %v666_v7 }
 0x12b   :  { %668 = vmatprep.subr.bf16.mxu1 %v771_v0 }
 0x12e   :  { %670 = vmatpush3.bf16.msra.mxu1 %v669_v10 }
 0x12f   :  { %671 = vmatprep.subr.bf16.mxu1 %v771_v0 }
 0x132   :  { %673 = vmatpush3.bf16.msra.mxu1 %v672_v18 }
 0x133   :  { %674 = vmatprep.subr.bf16.mxu1 %v771_v0 }
 0x136   :  { %676 = vmatpush3.bf16.msra.mxu1 %v675_v21 }
 0x137   :  { %677 = vmatprep.subr.bf16.mxu1 %v771_v0 }
 0x13a   :  { %679 = vmatpush3.bf16.msra.mxu1 %v678_v24 }
 0x1f0   :  { %v221_v12 = vpop.f32.mrb[0].mxu1 }
 0x1f1   :  { %v222_v13 = vadd.f32 %v434_v11, %v221_v12  ;;  %v534_v14 = vpop.f32.mrb[1].mxu1 }
 0x1f3   :  { %690 = vtanh.f32 %v222_v13 }
 0x1fd   :  { %v691_v15 = vpop.eup %690 }
 0x1fe   :  { %568 = vmatmul.mubr.f32.vlgmr.msra.gmra.mrb[2].mxu0 %v691_v15 }
 0x2d1   :  { %v313_v26 = vpop.f32.mrb[2].mxu0 }
 0x2d2   :  { %v314_v27 = vadd.f32 %v435_v25, %v313_v26  ;;  %v569_v28 = vpop.f32.mrb[3].mxu0 }
 0x2d4   :  { %692 = vtanh.f32 %v314_v27 }
 0x2de   :  { %v693_v29 = vpop.eup %692 }
 0x2df   :  { %603 = vmatmul.mubr.f32.vlgmr.msra.gmra.mrb[2].mxu1 %v693_v29 }
 0x3b2   :  { %v405_v31 = vpop.f32.mrb[2].mxu1 }
 0x3b3   :  { %v406_v32 = vadd.f32 %v436_v30, %v405_v31  ;;  %v604_v33 = vpop.f32.mrb[3].mxu1 }
 0x3b5   :  { %694 = vtanh.f32 %v406_v32 }
 0x3bf   :  { %v695_v35 = vpop.eup %694 }
 0x3c0   :  { %v416_v36 = vmul.f32 %v695_v35, %v437_v34 }
 0x3c2   :  { %417 = vadd.xlane.f32.xlu0 %v416_v36 }
 0x44f   :  { %v418_v38 = vpop.xlane.xlu0 %417 }
 0x450   :  { %v423_v0 = vadd.f32 %v438_v37, %v418_v38 }
 0x452   :  { %425 = vst.msk [vmem:[%s869_s3] sm:$0xff] %vm424_vm2, %v423_v0 }
 0x453   :  { %430 = vsyncpa [#allocation3], 1 }
 0x454   :  { %431 = vsyncpa [#allocation5], 1 }

</bundles_post_ra>
